<compile_context>
chip_gen: v6e
topology: v6e:2x2x1
jax: 0.10.0
libtpu: 0.0.40
codegen_flags: <defaults>
</compile_context>

<pallas_src>
import functools

import jax
import jax.numpy as jnp
from jax.experimental import pallas as pl
from jax.experimental.pallas import tpu as pltpu

LN_EPS = 1e-5  # PyTorch nn.LayerNorm default


def _round_up(x, m):
    return ((x + m - 1) // m) * m


def _cdiv(a, b):
    return (a + b - 1) // b


# ----------------------------------------------------------------------------
# Kernel: one (batch-tile, layer) grid step of LayerNorm(ReLU(x @ W + b)).
# ----------------------------------------------------------------------------
def _mlp_stream_kernel(inv_n_ref, x_ref, w_ref, b_ref, g_ref, beta_ref,
                       o_ref, act_ref):
    l = pl.program_id(1)
    last = pl.num_programs(1) - 1

    # Layer 0: seed the VMEM-resident activation from the input tile.
    @pl.when(l == 0)
    def _():
        act_ref[...] = x_ref[...]

    # Linear on the MXU (native-dtype operands, f32 accumulation) + f32 bias.
    y = jnp.dot(act_ref[...], w_ref[0], preferred_element_type=jnp.float32)
    y = y + b_ref[0]                              # (1, D_pad) f32 bias row

    # ReLU (VPU).
    # TODO(synk): only ReLU is implemented; other activation_func choices would
    # swap this jnp.maximum (and the matching LN-fold assumptions).
    y = jnp.maximum(y, 0.0)

    # LayerNorm statistics over the TRUE feature count of this layer.  Padded
    # lanes of y are exactly 0 (zero-padded W columns / bias), so the unmasked
    # sums already equal the true-n sums; E[y^2] - mean^2 needs no mask and is
    # benign in f32 for post-ReLU activations.
    inv_n = inv_n_ref[l]                          # f32 scalar from SMEM
    mean = jnp.sum(y, axis=-1, keepdims=True) * inv_n
    mean_sq = jnp.sum(y * y, axis=-1, keepdims=True) * inv_n
    var = mean_sq - mean * mean
    inv_std = jax.lax.rsqrt(var + LN_EPS)         # EUP
    centered = y - mean

    # Non-final layers: gamma/beta were folded into the next layer's W/b on the
    # host, so only the plain normalization runs here (1 VPU mul).
    @pl.when(l < last)
    def _():
        act_ref[...] = (centered * inv_std).astype(act_ref.dtype)

    # Final layer: apply its affine (padded gamma/beta are 0) and emit.
    @pl.when(l == last)
    def _():
        out = centered * (inv_std * g_ref[...]) + beta_ref[...]
        o_ref[...] = out.astype(o_ref.dtype)


# ----------------------------------------------------------------------------
# Hardware-aware sizing helpers.
# ----------------------------------------------------------------------------
def _vmem_budget_bytes():
    cap = 64 * 1024 * 1024  # most restrictive generation (v7x) as fallback
    try:
        cap = int(pltpu.get_tpu_info().vmem_capacity_bytes)
    except Exception:
        pass
    return (cap * 7) // 8


def _mxu_m_cap():
    # v6e / v7x MXUs are 256 wide in M; older generations are 128.
    try:
        kind = jax.devices()[0].device_kind.lower()
        if any(v in kind for v in ("v2", "v3", "v4", "v5")):
            return 128
    except Exception:
        pass
    return 256


def _choose_batch_tiling(batch, sublane, m_cap):
    pb = _round_up(max(batch, sublane), sublane)
    if pb <= sublane:
        return pb, pb
    # Prefer >=2 steps along the "parallel" batch axis (v7x has two
    # TensorCores) while capping the tile at the MXU M-width.
    tm = min(m_cap, max(sublane, _round_up(_cdiv(pb, 2), sublane)))
    pb = _round_up(pb, tm)
    return pb, tm


# ----------------------------------------------------------------------------
# Forward wrapper.
# ----------------------------------------------------------------------------
@functools.partial(jax.jit, static_argnames=("out_dim",))
def mlp_layer_forward(x, w_stack, b_stack, g_last, beta_last, inv_dims, *,
                      out_dim):
    """Forward pass of MLPLayer: one fused pallas_call, layer axis streamed."""
    batch, in_dim = x.shape
    num_layers, d_pad, _ = w_stack.shape

    x_item = jnp.dtype(x.dtype).itemsize
    sublane = 8 if x_item >= 4 else 16            # native (sublane, 128) tile
    pb, tm = _choose_batch_tiling(batch, sublane, _mxu_m_cap())

    # Zero-pad the input; padded rows/lanes stay harmless through the stack.
    x_pad = jnp.zeros((pb, d_pad), x.dtype).at[:batch, :in_dim].set(x)

    # VMEM footprint: streamed weight block + x/out tiles (double-buffered) +
    # activation scratch + small per-layer vectors.  Clamp to device capacity.
    w_item = jnp.dtype(w_stack.dtype).itemsize
    est = (2 * d_pad * d_pad * w_item             # streamed W block, 2 buffers
           + 4 * tm * d_pad * x_item              # x tile + out tile, 2 bufs each
           + tm * d_pad * x_item                  # activation scratch
           + 8 * d_pad * 4 + 4096)                # bias/gamma/beta + slack
    vmem_limit = int(min(_vmem_budget_bytes(),
                         max(2 * est, 16 * 1024 * 1024)))

    grid_spec = pltpu.PrefetchScalarGridSpec(
        num_scalar_prefetch=1,                    # per-layer 1/n in SMEM
        grid=(pb // tm, num_layers),
        in_specs=[
            pl.BlockSpec((tm, d_pad), lambda i, l, inv_n: (i, 0)),           # x
            pl.BlockSpec((1, d_pad, d_pad), lambda i, l, inv_n: (l, 0, 0)),  # W_l
            pl.BlockSpec((1, 1, d_pad), lambda i, l, inv_n: (l, 0, 0)),      # b_l
            pl.BlockSpec((1, d_pad), lambda i, l, inv_n: (0, 0)),            # gamma_L
            pl.BlockSpec((1, d_pad), lambda i, l, inv_n: (0, 0)),            # beta_L
        ],
        out_specs=pl.BlockSpec((tm, d_pad), lambda i, l, inv_n: (i, 0)),
        scratch_shapes=[pltpu.VMEM((tm, d_pad), x.dtype)],                   # act
    )

    out = pl.pallas_call(
        _mlp_stream_kernel,
        out_shape=jax.ShapeDtypeStruct((pb, d_pad), x.dtype),
        grid_spec=grid_spec,
        compiler_params=pltpu.CompilerParams(
            dimension_semantics=("parallel", "arbitrary"),
            vmem_limit_bytes=vmem_limit,
        ),
    )(inv_dims, x_pad, w_stack, b_stack, g_last, beta_last)

    return out[:batch, :out_dim]


# ----------------------------------------------------------------------------
# Parameter construction / packing (host side).
# ----------------------------------------------------------------------------
def init_mlp_params(key, input_dim, hidden_sizes, dtype=jnp.float32):
    """Per-layer params matching the module: orthogonal(gain=sqrt(2)) weight,
    zero bias, LayerNorm gamma=1 / beta=0."""
    params = []
    in_dim = input_dim
    ortho = jax.nn.initializers.orthogonal(scale=float(jnp.sqrt(2.0)))
    for h in hidden_sizes:
        key, wk = jax.random.split(key)
        w = ortho(wk, (in_dim, h), dtype)         # stored [in, out]: y = x @ W + b
        b = jnp.zeros((h,), dtype)
        gamma = jnp.ones((h,), dtype)
        beta = jnp.zeros((h,), dtype)
        params.append((w, b, gamma, beta))
        in_dim = h
    return params


def pack_params(params, input_dim, weight_dtype=jnp.float32):
    """Fold non-final LayerNorm affines into the next layer, zero-pad every
    layer to a common lane-dense width, and stack per-kind."""
    dims = [int(input_dim)] + [int(w.shape[1]) for (w, _, _, _) in params]
    d_pad = _round_up(max(dims), 128)
    num_layers = len(params)

    # (norm_l * gamma_l + beta_l) @ W_{l+1} + b_{l+1}
    #   = norm_l @ (diag(gamma_l) @ W_{l+1}) + (beta_l @ W_{l+1} + b_{l+1})
    wb = [[jnp.asarray(w, jnp.float32), jnp.asarray(b, jnp.float32)]
          for (w, b, _, _) in params]
    for l in range(num_layers - 1):
        g = jnp.asarray(params[l][2], jnp.float32)
        bt = jnp.asarray(params[l][3], jnp.float32)
        w_next, b_next = wb[l + 1]
        wb[l + 1][1] = b_next + bt @ w_next       # uses the UNfolded W_{l+1}
        wb[l + 1][0] = g[:, None] * w_next

    w_stack = jnp.zeros((num_layers, d_pad, d_pad), weight_dtype)
    b_stack = jnp.zeros((num_layers, 1, d_pad), jnp.float32)
    for l, (w, b) in enumerate(wb):
        ki, ko = w.shape
        w_stack = w_stack.at[l, :ki, :ko].set(w.astype(weight_dtype))
        b_stack = b_stack.at[l, 0, :ko].set(b)

    out_dim = dims[-1]
    g_last = jnp.zeros((1, d_pad), jnp.float32).at[0, :out_dim].set(
        jnp.asarray(params[-1][2], jnp.float32))
    beta_last = jnp.zeros((1, d_pad), jnp.float32).at[0, :out_dim].set(
        jnp.asarray(params[-1][3], jnp.float32))

    inv_dims = 1.0 / jnp.asarray(dims[1:], jnp.float32)   # per-layer 1/n (SMEM)
    return w_stack, b_stack, g_last, beta_last, inv_dims, out_dim


def _reference_forward(x, params):
    """Pure-JAX reference (unpadded, unfolded) for the correctness check."""
    y = jnp.asarray(x, jnp.float32)
    for (w, b, gamma, beta) in params:
        y = jnp.maximum(y @ jnp.asarray(w, jnp.float32) + b, 0.0)
        mean = jnp.mean(y, axis=-1, keepdims=True)
        var = jnp.mean((y - mean) ** 2, axis=-1, keepdims=True)
        y = (y - mean) * jax.lax.rsqrt(var + LN_EPS) * gamma + beta
    return y


if __name__ == "__main__":
    key = jax.random.PRNGKey(0)
    key, xk, gk, bk = jax.random.split(key, 4)

    batch = 8
    input_dim = 32
    hidden_sizes = [64, 64]  # two (Linear -> ReLU -> LayerNorm) blocks

    x = jax.random.normal(xk, (batch, input_dim), jnp.float32)
    params = init_mlp_params(key, input_dim, hidden_sizes)

    # Perturb the LayerNorm affines away from their (1, 0) defaults so the
    # host-side gamma/beta folding is actually exercised by the check.
    gkeys = jax.random.split(gk, len(params))
    bkeys = jax.random.split(bk, len(params))
    params = [
        (w, b,
         g + 0.1 * jax.random.normal(gkeys[i], g.shape, g.dtype),
         bt + 0.1 * jax.random.normal(bkeys[i], bt.shape, bt.dtype))
        for i, (w, b, g, bt) in enumerate(params)
    ]

    w_stack, b_stack, g_last, beta_last, inv_dims, out_dim = pack_params(
        params, input_dim, weight_dtype=jnp.float32)

    out = mlp_layer_forward(x, w_stack, b_stack, g_last, beta_last, inv_dims,
                            out_dim=out_dim)
    out = jax.block_until_ready(out)

    ref = _reference_forward(x, params)
    assert out.shape == (batch, hidden_sizes[-1])
    err = float(jnp.max(jnp.abs(out - ref)))
    assert jnp.allclose(out, ref, atol=2e-4, rtol=2e-4), f"max abs err {err}"

    print("KERNEL_OK")
</pallas_src>

<mosaic_0001>
module attributes {stable_mosaic.version = 11 : i64} {
  func.func @_mlp_stream_kernel(%arg0: i32, %arg1: i32, %arg2: memref<2xf32, #tpu.memory_space<smem>>, %arg3: memref<8x128xf32, #tpu.memory_space<vmem>>, %arg4: memref<1x128x128xf32, #tpu.memory_space<vmem>>, %arg5: memref<1x1x128xf32, #tpu.memory_space<vmem>>, %arg6: memref<1x128xf32, #tpu.memory_space<vmem>>, %arg7: memref<1x128xf32, #tpu.memory_space<vmem>>, %arg8: memref<8x128xf32, #tpu.memory_space<vmem>>, %arg9: memref<8x128xf32, #tpu.memory_space<vmem>>) attributes {dimension_semantics = [#tpu.dimension_semantics<parallel>, #tpu.dimension_semantics<arbitrary>], iteration_bounds = array<i64: 1, 2>, scalar_prefetch = 1 : i64, scratch_operands = 1 : i64, tpu.core_type = #tpu.core_type<tc>, window_params = [{transform_indices = @transform_0, window_bounds = array<i64: 8, 128>}, {transform_indices = @transform_1, window_bounds = array<i64: 1, 128, 128>}, {transform_indices = @transform_2, window_bounds = array<i64: 1, 1, 128>}, {pipeline_mode = #tpu.pipeline_mode<synchronous>, transform_indices = @transform_3, window_bounds = array<i64: 1, 128>}, {pipeline_mode = #tpu.pipeline_mode<synchronous>, transform_indices = @transform_4, window_bounds = array<i64: 1, 128>}, {transform_indices = @transform_5, window_bounds = array<i64: 8, 128>}]} {
    %c0_i32 = arith.constant 0 : i32
    %0 = arith.cmpi eq, %arg1, %c0_i32 : i32
    %1 = arith.extui %0 : i1 to i32
    %c0_i32_0 = arith.constant 0 : i32
    %2 = arith.cmpi ne, %1, %c0_i32_0 : i32
    scf.if %2 {
      %c0_15 = arith.constant 0 : index
      %c0_16 = arith.constant 0 : index
      %37 = vector.load %arg3[%c0_15, %c0_16] : memref<8x128xf32, #tpu.memory_space<vmem>>, vector<8x128xf32>
      %c0_17 = arith.constant 0 : index
      %c0_18 = arith.constant 0 : index
      %38 = vector.load %arg9[%c0_17, %c0_18] : memref<8x128xf32, #tpu.memory_space<vmem>>, vector<8x128xf32>
      tpu.vector_store %arg9[%c0_17, %c0_18], %37 {strides = array<i32>} : memref<8x128xf32, #tpu.memory_space<vmem>>, vector<8x128xf32>,
    } else {
    }
    %c0 = arith.constant 0 : index
    %c0_1 = arith.constant 0 : index
    %3 = vector.load %arg9[%c0, %c0_1] : memref<8x128xf32, #tpu.memory_space<vmem>>, vector<8x128xf32>
    %c0_2 = arith.constant 0 : index
    %c0_3 = arith.constant 0 : index
    %c0_4 = arith.constant 0 : index
    %4 = vector.load %arg4[%c0_2, %c0_3, %c0_4] : memref<1x128x128xf32, #tpu.memory_space<vmem>>, vector<1x128x128xf32>
    %5 = vector.shape_cast %4 : vector<1x128x128xf32> to vector<128x128xf32>
    %cst = arith.constant dense<0.000000e+00> : vector<8x128xf32>
    %6 = tpu.matmul %3, %5, %cst {dimension_numbers = #tpu.dot_dimension_numbers<[1], [0], [0], [1], [0, 0, 1, 1], [], []>} : vector<8x128xf32>, vector<128x128xf32>, vector<8x128xf32> -> vector<8x128xf32>
    %c0_5 = arith.constant 0 : index
    %c0_6 = arith.constant 0 : index
    %c0_7 = arith.constant 0 : index
    %7 = vector.load %arg5[%c0_5, %c0_6, %c0_7] : memref<1x1x128xf32, #tpu.memory_space<vmem>>, vector<1x1x128xf32>
    %8 = vector.shape_cast %7 : vector<1x1x128xf32> to vector<1x128xf32>
    %9 = vector.broadcast %8 : vector<1x128xf32> to vector<8x128xf32>
    %10 = arith.addf %6, %9 : vector<8x128xf32>
    %cst_8 = arith.constant 0.000000e+00 : f32
    %11 = vector.broadcast %cst_8 : f32 to vector<8x128xf32>
    %12 = arith.maximumf %10, %11 : vector<8x128xf32>
    %13 = arith.index_cast %arg1 : i32 to index
    %14 = memref.load %arg2[%13] : memref<2xf32, #tpu.memory_space<smem>>
    %cst_9 = arith.constant dense<0.000000e+00> : vector<8xf32>
    %15 = vector.multi_reduction <add>, %12, %cst_9 [1] : vector<8x128xf32> to vector<8xf32>
    %16 = vector.shape_cast %15 : vector<8xf32> to vector<8x1xf32>
    %17 = vector.broadcast %14 : f32 to vector<8x1xf32>
    %18 = arith.mulf %16, %17 : vector<8x1xf32>
    %19 = arith.mulf %12, %12 : vector<8x128xf32>
    %cst_10 = arith.constant dense<0.000000e+00> : vector<8xf32>
    %20 = vector.multi_reduction <add>, %19, %cst_10 [1] : vector<8x128xf32> to vector<8xf32>
    %21 = vector.shape_cast %20 : vector<8xf32> to vector<8x1xf32>
    %22 = vector.broadcast %14 : f32 to vector<8x1xf32>
    %23 = arith.mulf %21, %22 : vector<8x1xf32>
    %24 = arith.mulf %18, %18 : vector<8x1xf32>
    %25 = arith.subf %23, %24 : vector<8x1xf32>
    %cst_11 = arith.constant 9.99999974E-6 : f32
    %26 = vector.broadcast %cst_11 : f32 to vector<8x1xf32>
    %27 = arith.addf %25, %26 : vector<8x1xf32>
    %28 = math.rsqrt %27 : vector<8x1xf32>
    %29 = vector.broadcast %18 : vector<8x1xf32> to vector<8x128xf32>
    %30 = arith.subf %12, %29 : vector<8x128xf32>
    %c1_i32 = arith.constant 1 : i32
    %31 = arith.cmpi slt, %arg1, %c1_i32 : i32
    %32 = arith.extui %31 : i1 to i32
    %c0_i32_12 = arith.constant 0 : i32
    %33 = arith.cmpi ne, %32, %c0_i32_12 : i32
    scf.if %33 {
      %37 = vector.broadcast %28 : vector<8x1xf32> to vector<8x128xf32>
      %38 = arith.mulf %30, %37 : vector<8x128xf32>
      %c0_15 = arith.constant 0 : index
      %c0_16 = arith.constant 0 : index
      %39 = vector.load %arg9[%c0_15, %c0_16] : memref<8x128xf32, #tpu.memory_space<vmem>>, vector<8x128xf32>
      tpu.vector_store %arg9[%c0_15, %c0_16], %38 {strides = array<i32>} : memref<8x128xf32, #tpu.memory_space<vmem>>, vector<8x128xf32>,
    } else {
    }
    %c1_i32_13 = arith.constant 1 : i32
    %34 = arith.cmpi eq, %arg1, %c1_i32_13 : i32
    %35 = arith.extui %34 : i1 to i32
    %c0_i32_14 = arith.constant 0 : i32
    %36 = arith.cmpi ne, %35, %c0_i32_14 : i32
    scf.if %36 {
      %c0_15 = arith.constant 0 : index
      %c0_16 = arith.constant 0 : index
      %37 = vector.load %arg6[%c0_15, %c0_16] : memref<1x128xf32, #tpu.memory_space<vmem>>, vector<1x128xf32>
      %38 = vector.broadcast %28 : vector<8x1xf32> to vector<8x128xf32>
      %39 = vector.broadcast %37 : vector<1x128xf32> to vector<8x128xf32>
      %40 = arith.mulf %38, %39 : vector<8x128xf32>
      %41 = arith.mulf %30, %40 : vector<8x128xf32>
      %c0_17 = arith.constant 0 : index
      %c0_18 = arith.constant 0 : index
      %42 = vector.load %arg7[%c0_17, %c0_18] : memref<1x128xf32, #tpu.memory_space<vmem>>, vector<1x128xf32>
      %43 = vector.broadcast %42 : vector<1x128xf32> to vector<8x128xf32>
      %44 = arith.addf %41, %43 : vector<8x128xf32>
      %c0_19 = arith.constant 0 : index
      %c0_20 = arith.constant 0 : index
      %45 = vector.load %arg8[%c0_19, %c0_20] : memref<8x128xf32, #tpu.memory_space<vmem>>, vector<8x128xf32>
      tpu.vector_store %arg8[%c0_19, %c0_20], %44 {strides = array<i32>} : memref<8x128xf32, #tpu.memory_space<vmem>>, vector<8x128xf32>,
    } else {
    }
    return
  }
  func.func @transform_0(%arg0: i32, %arg1: i32, %arg2: memref<2xf32, #tpu.memory_space<smem>>) -> (i32, i32) {
    %c0_i32 = arith.constant 0 : i32
    %c0_i32_0 = arith.constant 0 : i32
    return %arg0, %c0_i32 : i32, i32
  }
  func.func @transform_1(%arg0: i32, %arg1: i32, %arg2: memref<2xf32, #tpu.memory_space<smem>>) -> (i32, i32, i32) {
    %c0_i32 = arith.constant 0 : i32
    %c0_i32_0 = arith.constant 0 : i32
    %c0_i32_1 = arith.constant 0 : i32
    return %arg1, %c0_i32, %c0_i32_0 : i32, i32, i32
  }
  func.func @transform_2(%arg0: i32, %arg1: i32, %arg2: memref<2xf32, #tpu.memory_space<smem>>) -> (i32, i32, i32) {
    %c0_i32 = arith.constant 0 : i32
    %c0_i32_0 = arith.constant 0 : i32
    %c0_i32_1 = arith.constant 0 : i32
    return %arg1, %c0_i32, %c0_i32_0 : i32, i32, i32
  }
  func.func @transform_3(%arg0: i32, %arg1: i32, %arg2: memref<2xf32, #tpu.memory_space<smem>>) -> (i32, i32) {
    %c0_i32 = arith.constant 0 : i32
    %c0_i32_0 = arith.constant 0 : i32
    %c0_i32_1 = arith.constant 0 : i32
    return %c0_i32, %c0_i32_0 : i32, i32
  }
  func.func @transform_4(%arg0: i32, %arg1: i32, %arg2: memref<2xf32, #tpu.memory_space<smem>>) -> (i32, i32) {
    %c0_i32 = arith.constant 0 : i32
    %c0_i32_0 = arith.constant 0 : i32
    %c0_i32_1 = arith.constant 0 : i32
    return %c0_i32, %c0_i32_0 : i32, i32
  }
  func.func @transform_5(%arg0: i32, %arg1: i32, %arg2: memref<2xf32, #tpu.memory_space<smem>>) -> (i32, i32) {
    %c0_i32 = arith.constant 0 : i32
    %c0_i32_0 = arith.constant 0 : i32
    return %arg0, %c0_i32 : i32, i32
  }
}

</mosaic_0001>

<bundles_post_ra>
// kernel: mlp_layer_forward.1
= control target key start
LH: loop header
LB: loop body
LE: loop exit
PB: predicated region body
PF: predicated region fallthrough
CT: control target
= control target key end

     0   :  { %s985_s0 = inlined_call_operand.vmem [shape: f32[2], index: 0, kind: input, shape index: {}]   ;;  %s986_s1 = inlined_call_operand.vmem [shape: f32[8,128], index: 1, kind: input, shape index: {}]   ;;  %s987_s2 = inlined_call_operand.hbm [shape: f32[2,128,128], index: 2, kind: input, shape index: {}]   ;;  %s988_s3 = inlined_call_operand.vmem [shape: f32[2,1,128], index: 3, kind: input, shape index: {}]   ;;  %s989_s4 = inlined_call_operand.vmem [shape: f32[1,128], index: 4, kind: input, shape index: {}]   ;;  %s990_s5 = inlined_call_operand.vmem [shape: f32[1,128], index: 5, kind: input, shape index: {}]   ;;  %s991_s6 = inlined_call_operand.hbm [shape: f32[8,128], index: 6, kind: output, shape index: {}]  }
   0x1   :  { %s11_s23 = sshll.u32 %s985_s0, 4  ;;  %s12_s23 = int_to_ptr.vmem [resolvable:$true] %s11_s23 }
   0x2   :  { %s664_s24 = scalar_lea.vmem %s12_s23, 16  ;;  %p669_p1 = scmp.lt.s32.totalorder %s12_s23, %s12_s23 }
   0x3   :  { %p665_p0 = scmp.ne.s32.totalorder %s12_s23, %s664_s24  ;;  %p670_p2 = scmp.lt.s32.totalorder %s664_s24, %s664_s24 }
   0x5   :  { %p671_p3 = por %p670_p2, %p669_p1 }
   0x7   :  { %p672_p4 = pnand %p671_p3, %p665_p0 }
   0x9   :  { %675 = shalt.err (!%p672_p4)  }
   0xa   :  { %s786_s25 = smov [#allocation4]  }
   0xb   :  { %14 = dma.vmem_to_smem %s12_s23, 16, %s786_s25, [#allocation3] }
   0xc   :  { %752 = dma.done.wait [#allocation3], 16 }
   0xd   :  { %753 = vsyncadd [#allocation3], 4294967280 }
   0xe   :  { %16 = sfence }
   0xf   :  { %17 = vsyncpa [#allocation6], 0 }
  0x10   :  { %19 = vsyncpa [#allocation6 + $0x1], 0 }
  0x11   :  { %20 = vsyncpa [#allocation7], 0  ;;  %s831_s26 = smov 0   ;;  %s833_s27 = smov 0  }
  0x12   :  { %s835_s0 = smov 0   ;;  %s837_s28 = smov 0  }
  0x13   :  { %s839_s29 = smov 0   ;;  %s841_s30 = smov 0  }
  0x14 LB: > { %s523_s7 = sadd.s32 4294967295, %s784_s30   ;;  %s35_s8 = sadd.s32 1, %s780_s29  ;;  %s784_s30 = sphi %s841_s30, %s26_s30   ;;  %s780_s29 = sphi %s839_s29, %s1000_s29   ;;  %s776_s28 = sphi %s837_s28, %s999_s28   ;;  %s772_s0 = sphi %s835_s0, %s998_s0   ;;  %s768_s27 = sphi %s833_s27, %s997_s27   ;;  %s764_s26 = sphi %s831_s26, %s996_s26  }
  0x15   : > { %p36_p5 = scmp.ge.s32.totalorder %s35_s8, 2  ;;  %s71_s9 = sadd.s32 1, %s772_s0 }
  0x16   : > { %p78_p6 = scmp.ne.s32.totalorder %s772_s0, %s768_s27  ;;  %p79_p7 = scmp.eq.s32.totalorder %s784_s30, 0 }
  0x17   : > { %s1002_s8 = smov (%p36_p5, %s35_s8), 0  ;;  %p84_p9 = scmp.ne.s32.totalorder %s768_s27, %s764_s26 }
  0x18   : > { %p867_p8 = por %p79_p7, %p78_p6  ;;  %s68_s11 = ssub.s32 %s780_s29, %s1002_s8 }
  0x19   : > { %p85_p10 = scmp.eq.s32.totalorder %s523_s7, 0  ;;  %p69_p11 = scmp.eq.s32.totalorder %s68_s11, 0 }
  0x1a   : > { %p605_p13 = scmp.lt.s32.totalorder %s784_s30, 2  ;;  %s215_s14 = sand.u32 1, %s772_s0  }
  0x1b   : > { %p876_p12 = por %p85_p10, %p84_p9  ;;  %s542_s15 = sshll.u32 %s780_s29, 11 }
  0x1c   : > { %s882_s13 = scalar_select %p69_p11, %s772_s0, %s71_s9  }
  0x1d   : > { %s527_s16 = sshll.u32 %s215_s14, 7  ;;  %s225_s19 = scalar_lea.hbm %s987_s2, %s542_s15 }
  0x1e   : > { %s219_s20 = scalar_lea.vmem [#allocation5], %s527_s16  ;;  %p891_p0 = pnand %p605_p13, %p867_p8 }
  0x1f   : > { %s226_s21 = sshll.u32 %s219_s20, 4  ;;  %s216_s23 = scalar_lea.sflag [#allocation6], %s215_s14  ;;  %s227_s21 = int_to_ptr.vmem [resolvable:$true] %s226_s21 }
  0x20   : > { %p678_p1 = pneg %p891_p0  ;;  %s689_s24 = scalar_lea.vmem %s227_s21, 2048 }
  0x21   : > { %p690_p2 = scmp.ne.s32.totalorder %s227_s21, %s689_s24  ;;  %s787_s25 = smov [#allocation5]  }
  0x22   : > { %s694_s26 = sshll.u32 %s787_s25, 4  ;;  %s695_s26 = int_to_ptr.vmem [resolvable:$false] %s694_s26 }
  0x23   : > { %p692_p3 = pnand %p690_p2, %p678_p1  ;;  %s696_s9 = scalar_lea.vmem %s695_s26, 4096 }
  0x24   : > { %p697_p5 = scmp.lt.s32.totalorder %s227_s21, %s695_s26  ;;  %p698_p6 = scmp.lt.s32.totalorder %s696_s9, %s689_s24 }
  0x25   : > { %p693_p4 = pneg %p692_p3 }
  0x26   : > { %p699_p7 = por %p698_p6, %p697_p5 }
  0x28   : > { %p700_p8 = pnand %p699_p7, %p693_p4 }
  0x2a   : > { %703 = shalt.err (!%p700_p8)
}
  0x2b   : > { %s788_s10 = smov 128   ;;  %s789_s11 = smov 8  }
  0x2c   : > { %604 = dma.hbm_to_vmem [thread:$0]  (!%p891_p0), %s225_s19, 2048, %s227_s21, %s216_s23, %s788_s10, %s788_s10, %s789_s11  }
  0x2d   : > { %p530_p9 = scmp.ge.s32.totalorder %s784_s30, 1  ;;  %p240_p10 = scmp.lt.s32.totalorder %s784_s30, 3 }
  0x2f   : > { %p241_p11 = pnand %p530_p9, %p240_p10 }
  0x30   : > { %s246_s14 = sand.u32 (!%p241_p11), 1, %s768_s27  }
  0x31   : > { %244 = sbr.rel (%p241_p11) target bundleno = 490 (0x1ea), region = 40  ;;  %s531_s15 = sshll.u32 (!%p241_p11), %s246_s14, 7 }
  0x32   : > { %s247_s16 = scalar_lea.sflag (!%p241_p11), [#allocation6], %s246_s14  ;;  %s902_s17 = scalar_lea.vmem (!%p241_p11), [#allocation5], %s531_s15 }
  0x36   : > { %755 = dma.done.wait (%p876_p12), %s247_s16, 2048  }
  0x37   : > { %757 = vsyncadd (%p876_p12), %s247_s16, 4294965248  ;;  %p283_p13 = scmp.lt.s32.totalorder %s776_s28, 1  ;;  %p532_p0 = scmp.ne.s32.totalorder %s776_s28, 0 }
  0x39   : > { %s910_s18 = scalar_select %p283_p13, %s776_s28, 1 }
  0x3a   : > { %289 = sbr.rel (%p532_p0) target bundleno = 65 (0x41), region = 48 }
  0x3b   : > { %s285_s21 = scalar_lea.vmem %s988_s3, %s910_s18 }
  0x3f   : > { %v290_v0 = vld [vmem:[%s986_s1] sm:$0xff] }
  0x40   : > { %291 = vst [vmem:[#allocation2] sm:$0xff] %v290_v0 }
  0x41 PF: > { %v308_v1 = vld [vmem:[%s902_s17 + $0x78] sm:$0xff]  ;;  %v790_v2 = vmov 0.0   ;;  %v307_v3 = vld [vmem:[%s902_s17 + $0x70] sm:$0xff]  ;;  %vm791_vm0 = vmmov 0   ;;  %v306_v4 = vld [vmem:[%s902_s17 + $0x68] sm:$0xff]  ;;  %s387_s25 = sld [smem:[#allocation4 + %s776_s28]] }
  0x42   : > { %560 = vmatprep.subr.mxu0 %v790_v2  ;;  %592 = vmatprep.mubr.msk.f32.mxu0 %vm791_vm0, %v790_v2  ;;  %v305_v5 = vld [vmem:[%s902_s17 + $0x60] sm:$0xff]  ;;  %v304_v6 = vld [vmem:[%s902_s17 + $0x58] sm:$0xff]  ;;  %v303_v7 = vld [vmem:[%s902_s17 + $0x50] sm:$0xff]  ;;  %p534_p12 = scmp.ge.s32.totalorder %s776_s28, 1 }
  0x43   : > { %561 = vmatpush3.msra.mxu0 %v308_v1  ;;  %v302_v8 = vld [vmem:[%s902_s17 + $0x48] sm:$0xff]  ;;  %v301_v9 = vld [vmem:[%s902_s17 + $0x40] sm:$0xff]  ;;  %v300_v10 = vld [vmem:[%s902_s17 + $0x38] sm:$0xff] }
  0x44   : > { %562 = vmatprep.subr.mxu0 %v790_v2  ;;  %v299_v11 = vld [vmem:[%s902_s17 + $0x30] sm:$0xff]  ;;  %v298_v12 = vld [vmem:[%s902_s17 + $0x28] sm:$0xff]  ;;  %v297_v13 = vld [vmem:[%s902_s17 + $0x20] sm:$0xff] }
  0x45   : > { %563 = vmatpush3.msra.mxu0 %v307_v3  ;;  %v296_v14 = vld [vmem:[%s902_s17 + $0x18] sm:$0xff]  ;;  %v295_v15 = vld [vmem:[%s902_s17 + $0x10] sm:$0xff]  ;;  %v294_v16 = vld [vmem:[%s902_s17 + $0x8] sm:$0xff] }
  0x46   : > { %564 = vmatprep.subr.mxu0 %v790_v2  ;;  %v293_v17 = vld [vmem:[%s902_s17] sm:$0xff]  ;;  %v533_v19 = vld [vmem:[%s285_s21] ss:$0 sm:$0xff] }
  0x47   : > { %565 = vmatpush3.msra.mxu0 %v306_v4  ;;  %v292_v18 = vld [vmem:[#allocation2] sm:$0xff]  ;;  %v390_v25 = vstv %s387_s25 }
  0x48   : > { %566 = vmatprep.subr.mxu0 %v790_v2 }
  0x49   : > { %567 = vmatpush3.msra.mxu0 %v305_v5 }
  0x4a   : > { %568 = vmatprep.subr.mxu0 %v790_v2 }
  0x4b   : > { %569 = vmatpush3.msra.mxu0 %v304_v6 }
  0x4c   : > { %570 = vmatprep.subr.mxu0 %v790_v2 }
  0x4d   : > { %571 = vmatpush3.msra.mxu0 %v303_v7 }
  0x4e   : > { %572 = vmatprep.subr.mxu0 %v790_v2 }
  0x4f   : > { %573 = vmatpush3.msra.mxu0 %v302_v8 }
  0x50   : > { %574 = vmatprep.subr.mxu0 %v790_v2 }
  0x51   : > { %575 = vmatpush3.msra.mxu0 %v301_v9 }
  0x52   : > { %576 = vmatprep.subr.mxu0 %v790_v2 }
  0x53   : > { %577 = vmatpush3.msra.mxu0 %v300_v10 }
  0x54   : > { %578 = vmatprep.subr.mxu0 %v790_v2 }
  0x55   : > { %579 = vmatpush3.msra.mxu0 %v299_v11 }
  0x56   : > { %580 = vmatprep.subr.mxu0 %v790_v2 }
  0x57   : > { %581 = vmatpush3.msra.mxu0 %v298_v12 }
  0x58   : > { %582 = vmatprep.subr.mxu0 %v790_v2 }
  0x59   : > { %583 = vmatpush3.msra.mxu0 %v297_v13 }
  0x5a   : > { %584 = vmatprep.subr.mxu0 %v790_v2 }
  0x5b   : > { %585 = vmatpush3.msra.mxu0 %v296_v14 }
  0x5c   : > { %586 = vmatprep.subr.mxu0 %v790_v2 }
  0x5d   : > { %587 = vmatpush3.msra.mxu0 %v295_v15 }
  0x5e   : > { %588 = vmatprep.subr.mxu0 %v790_v2 }
  0x5f   : > { %589 = vmatpush3.msra.mxu0 %v294_v16 }
  0x60   : > { %590 = vmatprep.subr.mxu0 %v790_v2 }
  0x61   : > { %591 = vmatpush3.msra.mxu0 %v293_v17 }
  0x62   : > { %593 = vmatmul.mubr.f32.vlgmr.msra.gmra.mxu0 %v292_v18 }
 0x122   : > { %v382_v20 = vpop.f32.mrf.mxu0 }
 0x123   : > { %v383_v21 = vadd.f32 %v533_v19, %v382_v20 }
 0x124   : > { %v594_v22 = vpop.f32.mrf.mxu0 }
 0x125   : > { %v386_v23 = vmax.f32 %v383_v21, 0.0 }
 0x127   : > { %388 = vadd.xlane.f32.xlu0 %v386_v23  ;;  %v392_v24 = vmul.f32 %v386_v23, %v386_v23 }
 0x12b   : > { %393 = vadd.xlane.f32.xlu0 %v392_v24 }
 0x1b0   : > { %v389_v26 = vpop.xlane.xlu0 %388 }
 0x1b1   : > { %v391_v27 = vmul.f32 %v390_v25, %v389_v26 }
 0x1b3   : > { %v400_v28 = vsub.f32 %v386_v23, %v391_v27  ;;  %v396_v30 = vmul.f32 %v391_v27, %v391_v27 }
 0x1b4   : > { %v394_v29 = vpop.xlane.xlu0 %393 }
 0x1b5   : > { %v395_v31 = vmul.f32 %v394_v29, %v390_v25 }
 0x1b7   : > { %v397_v32 = vsub.f32 %v395_v31, %v396_v30 }
 0x1b9   : > { %v398_v33 = vadd.f32 1e-05, %v397_v32 }
 0x1bb   : > { %662 = vrsqrt.f32 %v398_v33 }
 0x1c4   : > { %404 = sbr.rel (%p534_p12) target bundleno = 460 (0x1cc), region = 52 }
 0x1c8   : > { %v663_v34 = vpop.eup %662 }
 0x1c9   : > { %v405_v35 = vmul.f32 %v663_v34, %v400_v28 }
 0x1cb   : > { %406 = vst [vmem:[#allocation2] sm:$0xff] %v405_v35 }
 0x1cc PF: > { %p535_p1 = scmp.ne.s32.totalorder %s776_s28, 1 }
 0x1ce   : > { %410 = sbr.rel (%p535_p1) target bundleno = 475 (0x1db), region = 56 }
 0x1d3   : > { %v536_v36 = vld [vmem:[%s989_s4] ss:$0 sm:$0xff] }
 0x1d4   : > { %v418_v37 = vmul.f32 %v663_v34, %v536_v36  ;;  %v537_v38 = vld [vmem:[%s990_s5] ss:$0 sm:$0xff] }
 0x1d6   : > { %v419_v39 = vmul.f32 %v418_v37, %v400_v28 }
 0x1d8   : > { %v427_v40 = vadd.f32 %v537_v38, %v419_v39 }
 0x1da   : > { %428 = vst [vmem:[#allocation8] sm:$0xff] %v427_v40 }
 0x1db PF: > { %p952_p2 = scmp.eq.s32.totalorder %s523_s7, 1  ;;  %s792_s28 = smov [#allocation8]  }
 0x1dc   : > { %s438_s15 = sshll.u32 %s792_s28, 4  ;;  %s439_s15 = int_to_ptr.vmem [resolvable:$true] %s438_s15 }
 0x1dd   : > { %s704_s16 = scalar_lea.vmem %s439_s15, 128  ;;  %p711_p6 = scmp.lt.s32.totalorder %s439_s15, %s439_s15 }
 0x1de   : > { %p705_p3 = scmp.ne.s32.totalorder %s439_s15, %s704_s16  ;;  %p712_p7 = scmp.lt.s32.totalorder %s704_s16, %s704_s16 }
 0x1e0   : > { %p706_p4 = pnand %p705_p3, %p952_p2  ;;  %p713_p8 = por %p712_p7, %p711_p6 }
 0x1e2   : > { %p707_p5 = pneg %p706_p4 }
 0x1e4   : > { %p714_p9 = pnand %p713_p8, %p707_p5 }
 0x1e6   : > { %717 = shalt.err (!%p714_p9)
}
 0x1e7   : > { %598 = dma.vmem_to_hbm [thread:$0]  (%p952_p2), %s439_s15, 128, %s991_s6, [#allocation7]  }
 0x1e8   : > { %759 = dma.done.wait (%p952_p2), [#allocation7], 128  }
 0x1e9   : > { %761 = vsyncadd (%p952_p2), [#allocation7], 4294967168 }
 0x1ea PF: > { %s26_s30 = sadd.s32 1, %s784_s30   ;;  %s996_s26 = smov %s768_s27 }
 0x1eb   : > { %p23_p10 = scmp.ge.s32.totalorder %s26_s30, 4   ;;  %s997_s27 = smov %s772_s0 }
 0x1ec   : > { %s998_s0 = smov %s882_s13  ;;  %s999_s28 = smov %s780_s29 }
 0x1ed   : > { %s1000_s29 = smov %s1002_s8  ;;  %25 = sbr.rel (!%p23_p10) target bundleno = 20 (0x14), region = 96 }
 0x1f2   :  { %451 = vsyncpa [#allocation6], 1 }
 0x1f3   :  { %453 = vsyncpa [#allocation6 + $0x1], 1 }
 0x1f4   :  { %454 = vsyncpa [#allocation7], 1 }
 0x1f5   :  { %456 = vsyncpa [#allocation7 + $0x1], 1 }

</bundles_post_ra>
